<compile_context>
chip_gen: v6e
topology: v6e:2x2x1
jax: 0.10.0
libtpu: 0.0.40
codegen_flags: <defaults>
</compile_context>

<pallas_src>
import numpy as np
import jax
import jax.numpy as jnp
from jax.experimental import pallas as pl
from jax.experimental.pallas import tpu as pltpu


_NEG_BIG = -1e30  # finite "-inf" pad for padded class lanes / padded rows


def _round_up(x, m):
    return (x + m - 1) // m * m


def _choose_tile_b(batch, n_pad, itemsize):
    """Batch-tile size: sublane aligned, double-buffered input under budget."""
    sub = 8 if itemsize >= 4 else 16          # bf16 packs 2 rows per sublane
    per_buf_budget = 8 * 1024 * 1024          # keeps 2x buffers + f32 temps small
    tb = per_buf_budget // (n_pad * max(itemsize, 4))
    tb = max(sub, (tb // sub) * sub)
    tb = min(tb, 512)
    tb = min(tb, _round_up(batch, sub))
    return tb


def ce_loss_kernel(preds_ref, cnt_ref, tsum_ref, out_ref):
    # preds_ref: [TB, Np] native dtype; cnt_ref / tsum_ref: [TB, 1] f32.
    x = preds_ref[...].astype(jnp.float32)                       # cast in VMEM
    k = cnt_ref[...]                                             # [TB, 1]
    s = tsum_ref[...]                                            # [TB, 1]
    # numerically-stable row-wise logsumexp
    m = jnp.max(x, axis=1, keepdims=True)                        # [TB, 1]
    lse = jnp.log(jnp.sum(jnp.exp(x - m), axis=1, keepdims=True)) + m
    # sum over targets of (lse - x[target]) == K * lse - sum(target logits)
    per_row = k * lse - s                                        # [TB, 1]
    partial = jnp.sum(per_row)
    # lane-dense per-tile partial (wrapper reads [i, 0, 0] and reduces)
    out_ref[...] = jnp.full(out_ref.shape, partial, dtype=jnp.float32)


def ce_loss_pallas(preds, tgt_cnt, tgt_sum, batch_size):
    """preds: [B, N] (any float dtype), tgt_cnt/tgt_sum: [B, 1] f32."""
    B, N = preds.shape
    itemsize = jnp.dtype(preds.dtype).itemsize
    n_pad = _round_up(max(N, 128), 128)
    tb = _choose_tile_b(B, n_pad, itemsize)
    b_pad = _round_up(B, tb)
    num_tiles = b_pad // tb

    if (b_pad != B) or (n_pad != N):
        preds = jnp.pad(
            preds, ((0, b_pad - B), (0, n_pad - N)),
            constant_values=jnp.asarray(_NEG_BIG, dtype=preds.dtype))
    if b_pad != B:
        tgt_cnt = jnp.pad(tgt_cnt, ((0, b_pad - B), (0, 0)))
        tgt_sum = jnp.pad(tgt_sum, ((0, b_pad - B), (0, 0)))

    cost = pl.CostEstimate(
        flops=3 * b_pad * n_pad,
        transcendentals=b_pad * n_pad + b_pad,
        bytes_accessed=(b_pad * n_pad * itemsize
                        + 2 * b_pad * 4
                        + num_tiles * 8 * 128 * 4),
    )

    partials = pl.pallas_call(
        ce_loss_kernel,
        out_shape=jax.ShapeDtypeStruct((num_tiles, 8, 128), jnp.float32),
        grid=(num_tiles,),
        in_specs=[
            pl.BlockSpec((tb, n_pad), lambda i: (i, 0)),
            pl.BlockSpec((tb, 1), lambda i: (i, 0)),
            pl.BlockSpec((tb, 1), lambda i: (i, 0)),
        ],
        out_specs=pl.BlockSpec((1, 8, 128), lambda i: (i, 0, 0)),
        compiler_params=pltpu.CompilerParams(
            dimension_semantics=("parallel",),
            vmem_limit_bytes=48 * 1024 * 1024,
        ),
        cost_estimate=cost,
    )(preds, tgt_cnt, tgt_sum)

    # divide by the TRUE batch size (not padded / tile size)
    return partials[:, 0, 0].sum() / jnp.float32(batch_size)


def targets_to_count_and_sum(preds, targets):
    """Ragged targets -> per-row (count, sum of target logits) in f32.

    Tiny gather done in plain JAX (Pallas needs static shapes); the O(B*N)
    hot path stays inside the kernel.
    """
    B = len(targets)
    lens = [int(np.asarray(t).size) for t in targets]
    max_t = max(max(lens), 1)
    idx = np.zeros((B, max_t), dtype=np.int32)
    msk = np.zeros((B, max_t), dtype=np.float32)
    for j, t in enumerate(targets):
        t = np.asarray(t, dtype=np.int64).reshape(-1)
        idx[j, : t.size] = t
        msk[j, : t.size] = 1.0
    idx = jnp.asarray(idx)
    msk = jnp.asarray(msk)
    gathered = jnp.take_along_axis(preds, idx, axis=1).astype(jnp.float32)
    tgt_sum = jnp.sum(gathered * msk, axis=1, keepdims=True)   # [B, 1]
    tgt_cnt = jnp.sum(msk, axis=1, keepdims=True)              # [B, 1]
    return tgt_cnt, tgt_sum


def ce_loss_reference(preds, targets):
    """Plain-JAX reference mirroring the PyTorch forward exactly."""
    p = jax.nn.softmax(preds.astype(jnp.float32), axis=1)
    B = len(targets)
    total = 0.0
    for j, t in enumerate(targets):
        idx = jnp.asarray(np.asarray(t, dtype=np.int64))
        total = total + (-jnp.log(p[j, :][idx])).sum()
    return total / B


if __name__ == "__main__":
    key = jax.random.PRNGKey(0)

    batch_size = 4
    total_num_perts = 32

    preds = jax.random.normal(key, (batch_size, total_num_perts), dtype=jnp.float32)

    # Ragged multiclass targets (variable count per cell, repeats allowed).
    targets = [
        np.array([1, 5], dtype=np.int64),
        np.array([3], dtype=np.int64),
        np.array([7, 7, 2], dtype=np.int64),
        np.array([0, 31, 16], dtype=np.int64),
    ]

    # f32 storage path
    cnt, tsum = targets_to_count_and_sum(preds, targets)
    loss = jax.block_until_ready(ce_loss_pallas(preds, cnt, tsum, batch_size))
    ref = jax.block_until_ready(ce_loss_reference(preds, targets))
    assert np.allclose(np.asarray(loss), np.asarray(ref), rtol=1e-5, atol=1e-5), (
        f"pallas={float(loss)} ref={float(ref)}"
    )

    # bf16 storage path (no wrapper upcast; kernel casts in VMEM).
    preds_bf16 = preds.astype(jnp.bfloat16)
    cnt_b, tsum_b = targets_to_count_and_sum(preds_bf16, targets)
    loss_b = jax.block_until_ready(
        ce_loss_pallas(preds_bf16, cnt_b, tsum_b, batch_size))
    ref_b = jax.block_until_ready(
        ce_loss_reference(preds_bf16.astype(jnp.float32), targets))
    assert np.allclose(np.asarray(loss_b), np.asarray(ref_b), rtol=1e-3, atol=1e-3), (
        f"pallas_bf16={float(loss_b)} ref_bf16={float(ref_b)}"
    )

    print("KERNEL_OK")
</pallas_src>

<mosaic_0001>
module attributes {stable_mosaic.version = 11 : i64} {
  func.func @ce_loss_kernel(%arg0: i32, %arg1: memref<8x128xf32, #tpu.memory_space<vmem>>, %arg2: memref<8x1xf32, #tpu.memory_space<vmem>>, %arg3: memref<8x1xf32, #tpu.memory_space<vmem>>, %arg4: memref<1x8x128xf32, #tpu.memory_space<vmem>>) attributes {dimension_semantics = [#tpu.dimension_semantics<parallel>], iteration_bounds = array<i64: 1>, scalar_prefetch = 0 : i64, scratch_operands = 0 : i64, tpu.core_type = #tpu.core_type<tc>, window_params = [{transform_indices = @transform_0, window_bounds = array<i64: 8, 128>}, {transform_indices = @transform_1, window_bounds = array<i64: 8, 1>}, {transform_indices = @transform_2, window_bounds = array<i64: 8, 1>}, {transform_indices = @transform_3, window_bounds = array<i64: 1, 8, 128>}]} {
    %c0 = arith.constant 0 : index
    %c0_0 = arith.constant 0 : index
    %0 = vector.load %arg1[%c0, %c0_0] : memref<8x128xf32, #tpu.memory_space<vmem>>, vector<8x128xf32>
    %c0_1 = arith.constant 0 : index
    %c0_2 = arith.constant 0 : index
    %1 = vector.load %arg2[%c0_1, %c0_2] : memref<8x1xf32, #tpu.memory_space<vmem>>, vector<8x1xf32>
    %c0_3 = arith.constant 0 : index
    %c0_4 = arith.constant 0 : index
    %2 = vector.load %arg3[%c0_3, %c0_4] : memref<8x1xf32, #tpu.memory_space<vmem>>, vector<8x1xf32>
    %cst = arith.constant dense<0xFF800000> : vector<8xf32>
    %3 = vector.multi_reduction <maximumf>, %0, %cst [1] : vector<8x128xf32> to vector<8xf32>
    %4 = vector.shape_cast %3 : vector<8xf32> to vector<8x1xf32>
    %5 = vector.broadcast %4 : vector<8x1xf32> to vector<8x128xf32>
    %6 = arith.subf %0, %5 : vector<8x128xf32>
    %7 = math.exp %6 : vector<8x128xf32>
    %cst_5 = arith.constant dense<0.000000e+00> : vector<8xf32>
    %8 = vector.multi_reduction <add>, %7, %cst_5 [1] : vector<8x128xf32> to vector<8xf32>
    %9 = vector.shape_cast %8 : vector<8xf32> to vector<8x1xf32>
    %10 = math.log %9 : vector<8x1xf32>
    %11 = arith.addf %10, %4 : vector<8x1xf32>
    %12 = arith.mulf %1, %11 : vector<8x1xf32>
    %13 = arith.subf %12, %2 : vector<8x1xf32>
    %14 = vector.shape_cast %13 : vector<8x1xf32> to vector<1x8x1xf32>
    %cst_6 = arith.constant dense<0.000000e+00> : vector<1xf32>
    %15 = vector.multi_reduction <add>, %14, %cst_6 [1, 2] : vector<1x8x1xf32> to vector<1xf32>
    %16 = vector.shape_cast %15 : vector<1xf32> to vector<1x1x1xf32>
    %17 = vector.extract %16[0, 0, 0] : f32 from vector<1x1x1xf32>
    %18 = vector.broadcast %17 : f32 to vector<1x8x128xf32>
    %c0_7 = arith.constant 0 : index
    %c0_8 = arith.constant 0 : index
    %c0_9 = arith.constant 0 : index
    %19 = vector.load %arg4[%c0_7, %c0_8, %c0_9] : memref<1x8x128xf32, #tpu.memory_space<vmem>>, vector<1x8x128xf32>
    tpu.vector_store %arg4[%c0_7, %c0_8, %c0_9], %18 {strides = array<i32>} : memref<1x8x128xf32, #tpu.memory_space<vmem>>, vector<1x8x128xf32>,
    return
  }
  func.func @transform_0(%arg0: i32) -> (i32, i32) {
    %c0_i32 = arith.constant 0 : i32
    %c0_i32_0 = arith.constant 0 : i32
    return %arg0, %c0_i32 : i32, i32
  }
  func.func @transform_1(%arg0: i32) -> (i32, i32) {
    %c0_i32 = arith.constant 0 : i32
    %c0_i32_0 = arith.constant 0 : i32
    return %arg0, %c0_i32 : i32, i32
  }
  func.func @transform_2(%arg0: i32) -> (i32, i32) {
    %c0_i32 = arith.constant 0 : i32
    %c0_i32_0 = arith.constant 0 : i32
    return %arg0, %c0_i32 : i32, i32
  }
  func.func @transform_3(%arg0: i32) -> (i32, i32, i32) {
    %c0_i32 = arith.constant 0 : i32
    %c0_i32_0 = arith.constant 0 : i32
    %c0_i32_1 = arith.constant 0 : i32
    return %arg0, %c0_i32, %c0_i32_0 : i32, i32, i32
  }
}

</mosaic_0001>

<bundles_post_ra>
// kernel: tpu_custom_call.1
= control target key start
LH: loop header
LB: loop body
LE: loop exit
PB: predicated region body
PF: predicated region fallthrough
CT: control target
= control target key end

     0   :  { %s119_s0 = inlined_call_operand.vmem [shape: f32[8,128], index: 0, kind: input, shape index: {}]   ;;  %s120_s1 = inlined_call_operand.vmem [shape: f32[8,1], index: 1, kind: input, shape index: {}]   ;;  %s121_s2 = inlined_call_operand.vmem [shape: f32[8,1], index: 2, kind: input, shape index: {}]   ;;  %s122_s3 = inlined_call_operand.hbm [shape: f32[1,8,128], index: 3, kind: output, shape index: {}]  }
   0x1   :  { %v15_v0 = vld [vmem:[%s119_s0] sm:$0xff] }
   0x2   :  { %8 = vsyncpa [#allocation3], 0  ;;  %18 = vmax.xlane.f32.xlu0 %v15_v0  ;;  %v16_v8 = vld [vmem:[%s120_s1] sm:$0xff]  ;;  %vm30_vm0 = vcmask 7168   ;;  %s86_s0 = smov [#allocation2]  }
   0x3   :  { %v17_v10 = vld [vmem:[%s121_s2] sm:$0xff]  ;;  %s49_s1 = sshll.u32 %s86_s0, 4  ;;  %s50_s1 = int_to_ptr.vmem [resolvable:$true] %s49_s1 }
   0x4   :  { %s64_s2 = scalar_lea.vmem %s50_s1, 128  ;;  %p69_p1 = scmp.lt.s32.totalorder %s50_s1, %s50_s1 }
   0x5   :  { %p65_p0 = scmp.ne.s32.totalorder %s50_s1, %s64_s2  ;;  %p70_p2 = scmp.lt.s32.totalorder %s64_s2, %s64_s2 }
   0x7   :  { %p71_p3 = por %p70_p2, %p69_p1 }
   0x9   :  { %p72_p4 = pnand %p71_p3, %p65_p0 }
  0x8b   :  { %v19_v1 = vpop.xlane.xlu0 %18 }
  0x8c   :  { %v20_v2 = vsub.f32 %v15_v0, %v19_v1 }
  0x8e   :  { %v21_v3 = vmul.f32 1.442695, %v20_v2 }
  0x90   :  { %60 = vpow2.f32 %v21_v3 }
  0x9d   :  { %v61_v4 = vpop.eup %60 }
  0x9e   :  { %23 = vadd.xlane.f32.xlu0 %v61_v4 }
 0x127   :  { %v24_v5 = vpop.xlane.xlu0 %23 }
 0x128   :  { %62 = vlog2.f32 %v24_v5 }
 0x135   :  { %v63_v6 = vpop.eup %62 }
 0x136   :  { %v26_v7 = vmul.f32 0.6931472, %v63_v6 }
 0x138   :  { %v27_v9 = vadd.f32 %v26_v7, %v19_v1 }
 0x13a   :  { %v28_v11 = vmul.f32 %v27_v9, %v16_v8 }
 0x13c   :  { %v29_v12 = vsub.f32 %v28_v11, %v17_v10 }
 0x13e   :  { %v31_v13 = vsel %vm30_vm0, %v29_v12, 0.0 }
 0x13f   :  { %32 = vadd.xlane.f32.xlu1 %v31_v13 }
 0x1c8   :  { %v33_v14 = vpop.xlane.xlu1 %32 }
 0x1c9   :  { %v34_v15 = vrot.slane %v33_v14, 4 }
 0x1cb   :  { %v35_v16 = vadd.f32 %v34_v15, %v33_v14 }
 0x1cd   :  { %v36_v17 = vrot.slane %v35_v16, 2 }
 0x1cf   :  { %v37_v18 = vadd.f32 %v36_v17, %v35_v16 }
 0x1d1   :  { %v38_v19 = vrot.slane %v37_v18, 1 }
 0x1d3   :  { %v39_v20 = vadd.f32 %v38_v19, %v37_v18 }
 0x1d5   :  { %57 = vpush %v39_v20 }
 0x206   :  { %s58_s18 = spop %57 }
 0x207   :  { %v41_v21 = vstv %s58_s18 }
 0x208   :  { %42 = vst [vmem:[#allocation2] sm:$0xff] %v41_v21 }
 0x209   :  { %75 = shalt.err (!%p72_p4)
}
 0x20a   :  { %52 = dma.vmem_to_hbm [thread:$0]  %s50_s1, 128, %s122_s3, [#allocation3]  }
 0x20b   :  { %84 = dma.done.wait [#allocation3], 128  }
 0x20c   :  { %85 = vsyncadd [#allocation3], 4294967168 }
 0x20d   :  { %56 = vsyncpa [#allocation3], 1 }

</bundles_post_ra>
